<compile_context>
chip_gen: v5e
topology: v5e:2x2
jax: 0.10.0
libtpu: 0.0.40
codegen_flags: <defaults>
</compile_context>

<pallas_src>
import math
import jax
import jax.numpy as jnp
from jax.experimental import pallas as pl
from jax.experimental.pallas import tpu as pltpu

IN_NODES = 784
HIDDEN_NODES = 20      # NUM_HIDDEN_NODES
OUT_NODES = 1

DEFAULT_TILE_B = 2048  # safe on v5e/v6e/v7x VMEM budgets; amortizes per-step overhead


def _round_up(n, m):
    return ((n + m - 1) // m) * m


def mlp_kernel(x_ref, w1_ref, b1_ref, w2_ref, b2_ref, w3t_ref, b3_ref, o_ref):
    # Layer 1: bf16 x @ bf16 w1 on the MXU with f32 accumulation; bias+ReLU in f32.
    h1 = jnp.dot(x_ref[...], w1_ref[...],
                 preferred_element_type=jnp.float32) + b1_ref[...]
    h1 = jnp.maximum(h1, 0.0)
    # Layer 2: tiny f32 matmul, f32 bias + ReLU.
    h2 = jnp.dot(h1, w2_ref[...],
                 preferred_element_type=jnp.float32) + b2_ref[...]
    h2 = jnp.maximum(h2, 0.0)
    # Layer 3 (K=20, N=1): VPU multiply + lane reduction instead of an N=1 MXU matmul.
    z = jnp.sum(h2 * w3t_ref[...], axis=-1, keepdims=True) + b3_ref[...]
    # Sigmoid on the EUP, store f32.
    o_ref[...] = jax.nn.sigmoid(z).astype(o_ref.dtype)


def dense_classifier_forward(x, params, tile_b=DEFAULT_TILE_B):
    """x: (B, IN_NODES) float32. params: dict of w1,b1,w2,b2,w3,b3 (f32).
    Returns (B, OUT_NODES) float32, matching the PyTorch module's forward."""
    B = x.shape[0]
    assert x.shape[1] == IN_NODES

    # Tile size: multiple of 8 sublanes; don't over-pad tiny batches.
    tile_b = min(tile_b, _round_up(B, 8))
    b_pad = _round_up(B, tile_b)

    # x dominates HBM bytes -> stream it as bf16 (f32 accumulation happens in-kernel).
    x_bf16 = x.astype(jnp.bfloat16)
    if b_pad != B:
        x_bf16 = jnp.pad(x_bf16, ((0, b_pad - B), (0, 0)))

    w1 = params["w1"].astype(jnp.bfloat16)      # (784, 20) bf16
    b1 = params["b1"]                           # (1, 20)   f32
    w2 = params["w2"]                           # (20, 20)  f32
    b2 = params["b2"]                           # (1, 20)   f32
    w3t = params["w3"].reshape(1, HIDDEN_NODES) # (20,1) -> (1,20) for VPU reduction
    b3 = params["b3"]                           # (1, 1)    f32

    grid = (b_pad // tile_b,)

    def pinned(shape):
        return pl.BlockSpec(shape, lambda i: (0, 0))

    flops = (2 * b_pad * IN_NODES * HIDDEN_NODES
             + 2 * b_pad * HIDDEN_NODES * HIDDEN_NODES
             + 2 * b_pad * HIDDEN_NODES)
    bytes_accessed = (b_pad * IN_NODES * 2                 # bf16 x
                      + IN_NODES * HIDDEN_NODES * 2        # bf16 w1
                      + HIDDEN_NODES * HIDDEN_NODES * 4    # f32 w2
                      + 3 * HIDDEN_NODES * 4 + 4           # biases + w3
                      + b_pad * OUT_NODES * 4)             # f32 output

    out = pl.pallas_call(
        mlp_kernel,
        out_shape=jax.ShapeDtypeStruct((b_pad, OUT_NODES), jnp.float32),
        grid=grid,
        in_specs=[
            pl.BlockSpec((tile_b, IN_NODES), lambda i: (i, 0)),  # streamed x tiles
            pinned((IN_NODES, HIDDEN_NODES)),                    # w1 (pinned)
            pinned((1, HIDDEN_NODES)),                           # b1
            pinned((HIDDEN_NODES, HIDDEN_NODES)),                # w2
            pinned((1, HIDDEN_NODES)),                           # b2
            pinned((1, HIDDEN_NODES)),                           # w3^T
            pinned((1, OUT_NODES)),                              # b3
        ],
        out_specs=pl.BlockSpec((tile_b, OUT_NODES), lambda i: (i, 0)),
        compiler_params=pltpu.CompilerParams(
            dimension_semantics=("parallel",),        # batch rows independent
            vmem_limit_bytes=48 * 1024 * 1024,        # headroom on all generations
        ),
        cost_estimate=pl.CostEstimate(
            flops=flops, transcendentals=b_pad, bytes_accessed=bytes_accessed),
    )(x_bf16, w1, b1, w2, b2, w3t, b3)

    return out[:B]


def init_params(key):
    """Deterministic init mimicking PyTorch nn.Linear default:
       U(-1/sqrt(fan_in), 1/sqrt(fan_in)) for weights and biases."""
    ks = jax.random.split(key, 6)

    def linear_init(kw, kb, fan_in, fan_out):
        bound = 1.0 / math.sqrt(fan_in)
        w = jax.random.uniform(kw, (fan_in, fan_out), jnp.float32, -bound, bound)
        b = jax.random.uniform(kb, (1, fan_out), jnp.float32, -bound, bound)
        return w, b

    w1, b1 = linear_init(ks[0], ks[1], IN_NODES, HIDDEN_NODES)
    w2, b2 = linear_init(ks[2], ks[3], HIDDEN_NODES, HIDDEN_NODES)
    w3, b3 = linear_init(ks[4], ks[5], HIDDEN_NODES, OUT_NODES)
    return {"w1": w1, "b1": b1, "w2": w2, "b2": b2, "w3": w3, "b3": b3}


def reference_forward_f32(x, p):
    h1 = jnp.maximum(x @ p["w1"] + p["b1"], 0.0)
    h2 = jnp.maximum(h1 @ p["w2"] + p["b2"], 0.0)
    return jax.nn.sigmoid(h2 @ p["w3"] + p["b3"])


def reference_forward_bf16(x, p):
    # Mirrors the kernel's precision choices (bf16 x/w1, f32 accumulate/rest).
    h1 = jnp.dot(x.astype(jnp.bfloat16), p["w1"].astype(jnp.bfloat16),
                 preferred_element_type=jnp.float32) + p["b1"]
    h1 = jnp.maximum(h1, 0.0)
    h2 = jnp.maximum(jnp.dot(h1, p["w2"],
                             preferred_element_type=jnp.float32) + p["b2"], 0.0)
    return jax.nn.sigmoid(h2 @ p["w3"] + p["b3"])


if __name__ == "__main__":
    key = jax.random.PRNGKey(0)
    k_param, k_x = jax.random.split(key)
    params = init_params(k_param)

    # Small MNIST-like batch (BATCH_SIZE=100 in the original script): flattened
    # 28x28 images scaled to [0, 1). Not a multiple of the tile -> exercises padding.
    B = 100
    x = jax.random.uniform(k_x, (B, IN_NODES), jnp.float32, 0.0, 1.0)

    out = dense_classifier_forward(x, params)
    out = jax.block_until_ready(out)
    assert out.shape == (B, OUT_NODES)

    # Precision-matched reference (bf16 inputs, f32 accumulation): tight check.
    ref_bf16 = reference_forward_bf16(x, params)
    assert jnp.allclose(out, ref_bf16, atol=1e-3, rtol=1e-3)

    # Full-f32 reference: relaxed tolerance for the bf16 input cast.
    ref_f32 = reference_forward_f32(x, params)
    assert jnp.allclose(out, ref_f32, atol=2e-2, rtol=2e-2)

    print("KERNEL_OK")
</pallas_src>

<mosaic_0001>
module attributes {stable_mosaic.version = 11 : i64} {
  func.func @mlp_kernel(%arg0: i32, %arg1: memref<104x784xbf16, #tpu.memory_space<vmem>>, %arg2: memref<784x20xbf16, #tpu.memory_space<vmem>>, %arg3: memref<1x20xf32, #tpu.memory_space<vmem>>, %arg4: memref<20x20xf32, #tpu.memory_space<vmem>>, %arg5: memref<1x20xf32, #tpu.memory_space<vmem>>, %arg6: memref<1x20xf32, #tpu.memory_space<vmem>>, %arg7: memref<1x1xf32, #tpu.memory_space<vmem>>, %arg8: memref<104x1xf32, #tpu.memory_space<vmem>>) attributes {dimension_semantics = [#tpu.dimension_semantics<parallel>], iteration_bounds = array<i64: 1>, scalar_prefetch = 0 : i64, scratch_operands = 0 : i64, tpu.core_type = #tpu.core_type<tc>, window_params = [{transform_indices = @transform_0, window_bounds = array<i64: 104, 784>}, {pipeline_mode = #tpu.pipeline_mode<synchronous>, transform_indices = @transform_1, window_bounds = array<i64: 784, 20>}, {pipeline_mode = #tpu.pipeline_mode<synchronous>, transform_indices = @transform_2, window_bounds = array<i64: 1, 20>}, {pipeline_mode = #tpu.pipeline_mode<synchronous>, transform_indices = @transform_3, window_bounds = array<i64: 20, 20>}, {pipeline_mode = #tpu.pipeline_mode<synchronous>, transform_indices = @transform_4, window_bounds = array<i64: 1, 20>}, {pipeline_mode = #tpu.pipeline_mode<synchronous>, transform_indices = @transform_5, window_bounds = array<i64: 1, 20>}, {pipeline_mode = #tpu.pipeline_mode<synchronous>, transform_indices = @transform_6, window_bounds = array<i64: 1, 1>}, {transform_indices = @transform_7, window_bounds = array<i64: 104, 1>}]} {
    %c0 = arith.constant 0 : index
    %c0_0 = arith.constant 0 : index
    %0 = vector.load %arg1[%c0, %c0_0] : memref<104x784xbf16, #tpu.memory_space<vmem>>, vector<104x784xbf16>
    %c0_1 = arith.constant 0 : index
    %c0_2 = arith.constant 0 : index
    %1 = vector.load %arg2[%c0_1, %c0_2] : memref<784x20xbf16, #tpu.memory_space<vmem>>, vector<784x20xbf16>
    %cst = arith.constant dense<0.000000e+00> : vector<104x20xf32>
    %2 = tpu.matmul %0, %1, %cst {dimension_numbers = #tpu.dot_dimension_numbers<[1], [0], [0], [1], [0, 0, 1, 1], [], []>} : vector<104x784xbf16>, vector<784x20xbf16>, vector<104x20xf32> -> vector<104x20xf32>
    %c0_3 = arith.constant 0 : index
    %c0_4 = arith.constant 0 : index
    %3 = vector.load %arg3[%c0_3, %c0_4] : memref<1x20xf32, #tpu.memory_space<vmem>>, vector<1x20xf32>
    %4 = vector.broadcast %3 : vector<1x20xf32> to vector<104x20xf32>
    %5 = arith.addf %2, %4 : vector<104x20xf32>
    %cst_5 = arith.constant 0.000000e+00 : f32
    %6 = vector.broadcast %cst_5 : f32 to vector<104x20xf32>
    %7 = arith.maximumf %5, %6 : vector<104x20xf32>
    %c0_6 = arith.constant 0 : index
    %c0_7 = arith.constant 0 : index
    %8 = vector.load %arg4[%c0_6, %c0_7] : memref<20x20xf32, #tpu.memory_space<vmem>>, vector<20x20xf32>
    %cst_8 = arith.constant dense<0.000000e+00> : vector<104x20xf32>
    %9 = tpu.matmul %7, %8, %cst_8 {dimension_numbers = #tpu.dot_dimension_numbers<[1], [0], [0], [1], [0, 0, 1, 1], [], []>} : vector<104x20xf32>, vector<20x20xf32>, vector<104x20xf32> -> vector<104x20xf32>
    %c0_9 = arith.constant 0 : index
    %c0_10 = arith.constant 0 : index
    %10 = vector.load %arg5[%c0_9, %c0_10] : memref<1x20xf32, #tpu.memory_space<vmem>>, vector<1x20xf32>
    %11 = vector.broadcast %10 : vector<1x20xf32> to vector<104x20xf32>
    %12 = arith.addf %9, %11 : vector<104x20xf32>
    %cst_11 = arith.constant 0.000000e+00 : f32
    %13 = vector.broadcast %cst_11 : f32 to vector<104x20xf32>
    %14 = arith.maximumf %12, %13 : vector<104x20xf32>
    %c0_12 = arith.constant 0 : index
    %c0_13 = arith.constant 0 : index
    %15 = vector.load %arg6[%c0_12, %c0_13] : memref<1x20xf32, #tpu.memory_space<vmem>>, vector<1x20xf32>
    %16 = vector.broadcast %15 : vector<1x20xf32> to vector<104x20xf32>
    %17 = arith.mulf %14, %16 : vector<104x20xf32>
    %cst_14 = arith.constant dense<0.000000e+00> : vector<104xf32>
    %18 = vector.multi_reduction <add>, %17, %cst_14 [1] : vector<104x20xf32> to vector<104xf32>
    %19 = vector.shape_cast %18 : vector<104xf32> to vector<104x1xf32>
    %c0_15 = arith.constant 0 : index
    %c0_16 = arith.constant 0 : index
    %20 = vector.load %arg7[%c0_15, %c0_16] : memref<1x1xf32, #tpu.memory_space<vmem>>, vector<1x1xf32>
    %21 = vector.broadcast %20 : vector<1x1xf32> to vector<104x1xf32>
    %22 = arith.addf %19, %21 : vector<104x1xf32>
    %23 = arith.negf %22 : vector<104x1xf32>
    %24 = math.exp %23 : vector<104x1xf32>
    %cst_17 = arith.constant 1.000000e+00 : f32
    %25 = vector.broadcast %cst_17 : f32 to vector<104x1xf32>
    %26 = arith.addf %25, %24 : vector<104x1xf32>
    %27 = arith.divf %25, %26 : vector<104x1xf32>
    %c0_18 = arith.constant 0 : index
    %c0_19 = arith.constant 0 : index
    %28 = vector.load %arg8[%c0_18, %c0_19] : memref<104x1xf32, #tpu.memory_space<vmem>>, vector<104x1xf32>
    tpu.vector_store %arg8[%c0_18, %c0_19], %27 {strides = array<i32>} : memref<104x1xf32, #tpu.memory_space<vmem>>, vector<104x1xf32>,
    return
  }
  func.func @transform_0(%arg0: i32) -> (i32, i32) {
    %c0_i32 = arith.constant 0 : i32
    %c0_i32_0 = arith.constant 0 : i32
    return %arg0, %c0_i32 : i32, i32
  }
  func.func @transform_1(%arg0: i32) -> (i32, i32) {
    %c0_i32 = arith.constant 0 : i32
    %c0_i32_0 = arith.constant 0 : i32
    %c0_i32_1 = arith.constant 0 : i32
    return %c0_i32, %c0_i32_0 : i32, i32
  }
  func.func @transform_2(%arg0: i32) -> (i32, i32) {
    %c0_i32 = arith.constant 0 : i32
    %c0_i32_0 = arith.constant 0 : i32
    %c0_i32_1 = arith.constant 0 : i32
    return %c0_i32, %c0_i32_0 : i32, i32
  }
  func.func @transform_3(%arg0: i32) -> (i32, i32) {
    %c0_i32 = arith.constant 0 : i32
    %c0_i32_0 = arith.constant 0 : i32
    %c0_i32_1 = arith.constant 0 : i32
    return %c0_i32, %c0_i32_0 : i32, i32
  }
  func.func @transform_4(%arg0: i32) -> (i32, i32) {
    %c0_i32 = arith.constant 0 : i32
    %c0_i32_0 = arith.constant 0 : i32
    %c0_i32_1 = arith.constant 0 : i32
    return %c0_i32, %c0_i32_0 : i32, i32
  }
  func.func @transform_5(%arg0: i32) -> (i32, i32) {
    %c0_i32 = arith.constant 0 : i32
    %c0_i32_0 = arith.constant 0 : i32
    %c0_i32_1 = arith.constant 0 : i32
    return %c0_i32, %c0_i32_0 : i32, i32
  }
  func.func @transform_6(%arg0: i32) -> (i32, i32) {
    %c0_i32 = arith.constant 0 : i32
    %c0_i32_0 = arith.constant 0 : i32
    %c0_i32_1 = arith.constant 0 : i32
    return %c0_i32, %c0_i32_0 : i32, i32
  }
  func.func @transform_7(%arg0: i32) -> (i32, i32) {
    %c0_i32 = arith.constant 0 : i32
    %c0_i32_0 = arith.constant 0 : i32
    return %arg0, %c0_i32 : i32, i32
  }
}

</mosaic_0001>

<bundles_post_ra>
// kernel: tpu_custom_call.1
= control target key start
LH: loop header
LB: loop body
LE: loop exit
PB: predicated region body
PF: predicated region fallthrough
CT: control target
= control target key end

     0   :  { %vm1094_vm0 = vcmask 1043456   ;;  %vm711_vm1 = vcmask 130048   ;;  %vm1054_vm2 = vcmask 162816   ;;  %vm1487_vm5 = vcmask 7168   ;;  %s2715_s1 = inlined_call_operand.vmem [shape: bf16[784,20], index: 1, kind: input, shape index: {}]   ;;  %s2716_s2 = inlined_call_operand.vmem [shape: f32[1,20], index: 2, kind: input, shape index: {}]   ;;  %s2717_s0 = inlined_call_operand.vmem [shape: bf16[104,784], index: 0, kind: input, shape index: {}]   ;;  %s2718_s3 = inlined_call_operand.vmem [shape: f32[20,20], index: 3, kind: input, shape index: {}]   ;;  %s2719_s4 = inlined_call_operand.vmem [shape: f32[1,20], index: 4, kind: input, shape index: {}]   ;;  %s2720_s5 = inlined_call_operand.vmem [shape: f32[1,20], index: 5, kind: input, shape index: {}]   ;;  %s2721_s6 = inlined_call_operand.<no memory space> [shape: f32[1,1], index: 6, kind: input, shape index: {}]   ;;  %s2722_s7 = inlined_call_operand.vmem [shape: f32[104,1], index: 7, kind: output, shape index: {}]  }
   0x1   :  { %v1952_v0 = vld [vmem:[%s2715_s1 + $0x38] sm:$0xff]  ;;  %v1951_v4 = vld [vmem:[%s2715_s1 + $0x30] sm:$0xff]  ;;  %v1950_v8 = vld [vmem:[%s2715_s1 + $0x28] sm:$0xff] }
   0x2   :  { %v1960_v1 = vld [vmem:[%s2715_s1 + $0x78] sm:$0xff]  ;;  %733 = vmatpush.bf16.msra.mxu0 %v1952_v0  ;;  %v1959_v5 = vld [vmem:[%s2715_s1 + $0x70] sm:$0xff]  ;;  %v1958_v9 = vld [vmem:[%s2715_s1 + $0x68] sm:$0xff] }
   0x3   :  { %v1968_v2 = vld [vmem:[%s2715_s1 + $0xb8] sm:$0xff]  ;;  %776 = vmatpush.bf16.msra.mxu1 %v1960_v1  ;;  %v1967_v6 = vld [vmem:[%s2715_s1 + $0xb0] sm:$0xff]  ;;  %v1966_v10 = vld [vmem:[%s2715_s1 + $0xa8] sm:$0xff] }
   0x4   :  { %v1976_v3 = vld [vmem:[%s2715_s1 + $0xf8] sm:$0xff]  ;;  %819 = vmatpush.bf16.msra.mxu2 %v1968_v2  ;;  %v1975_v7 = vld [vmem:[%s2715_s1 + $0xf0] sm:$0xff]  ;;  %v1974_v11 = vld [vmem:[%s2715_s1 + $0xe8] sm:$0xff] }
   0x5   :  { %862 = vmatpush.bf16.msra.mxu3 %v1976_v3  ;;  %v1949_v12 = vld [vmem:[%s2715_s1 + $0x20] sm:$0xff]  ;;  %v1948_v16 = vld [vmem:[%s2715_s1 + $0x18] sm:$0xff]  ;;  %v1947_v20 = vld [vmem:[%s2715_s1 + $0x10] sm:$0xff] }
   0x6   :  { %734 = vmatpush.bf16.msra.mxu0 %v1951_v4  ;;  %v1957_v13 = vld [vmem:[%s2715_s1 + $0x60] sm:$0xff]  ;;  %v1956_v17 = vld [vmem:[%s2715_s1 + $0x58] sm:$0xff]  ;;  %v1955_v21 = vld [vmem:[%s2715_s1 + $0x50] sm:$0xff] }
   0x7   :  { %777 = vmatpush.bf16.msra.mxu1 %v1959_v5  ;;  %v1965_v14 = vld [vmem:[%s2715_s1 + $0xa0] sm:$0xff]  ;;  %v1964_v18 = vld [vmem:[%s2715_s1 + $0x98] sm:$0xff]  ;;  %v1963_v22 = vld [vmem:[%s2715_s1 + $0x90] sm:$0xff] }
   0x8   :  { %820 = vmatpush.bf16.msra.mxu2 %v1967_v6  ;;  %v1973_v15 = vld [vmem:[%s2715_s1 + $0xe0] sm:$0xff]  ;;  %v1972_v19 = vld [vmem:[%s2715_s1 + $0xd8] sm:$0xff]  ;;  %v1971_v23 = vld [vmem:[%s2715_s1 + $0xd0] sm:$0xff] }
   0x9   :  { %863 = vmatpush.bf16.msra.mxu3 %v1975_v7  ;;  %v1946_v24 = vld [vmem:[%s2715_s1 + $0x8] sm:$0xff]  ;;  %v1945_v28 = vld [vmem:[%s2715_s1] sm:$0xff]  ;;  %v1906_v33 = vld [vmem:[%s2717_s0 + $0x18] sm:$0xf0] }
   0xa   :  { %735 = vmatpush.bf16.msra.mxu0 %v1950_v8  ;;  %v1954_v25 = vld [vmem:[%s2715_s1 + $0x48] sm:$0xff]  ;;  %v1953_v29 = vld [vmem:[%s2715_s1 + $0x40] sm:$0xff]  ;;  %v1984_v41 = vld [vmem:[%s2715_s1 + $0x138] sm:$0xff] }
   0xb   :  { %778 = vmatpush.bf16.msra.mxu1 %v1958_v9  ;;  %v1962_v26 = vld [vmem:[%s2715_s1 + $0x88] sm:$0xff]  ;;  %v1961_v30 = vld [vmem:[%s2715_s1 + $0x80] sm:$0xff]  ;;  %v1992_v46 = vld [vmem:[%s2715_s1 + $0x178] sm:$0xff] }
   0xc   :  { %821 = vmatpush.bf16.msra.mxu2 %v1966_v10  ;;  %v1970_v27 = vld [vmem:[%s2715_s1 + $0xc8] sm:$0xff]  ;;  %v1969_v31 = vld [vmem:[%s2715_s1 + $0xc0] sm:$0xff]  ;;  %v1983_v47 = vld [vmem:[%s2715_s1 + $0x130] sm:$0xff] }
   0xd   :  { %864 = vmatpush.bf16.msra.mxu3 %v1974_v11  ;;  %v1507_v32 = vld [vmem:[%s2717_s0] sm:$0xf]  ;;  %v1903_v34 = vld [vmem:[%s2717_s0 + $0x4] sm:$0xf]  ;;  %v1515_v36 = vld [vmem:[%s2717_s0 + $0x8] sm:$0xf] }
   0xe   :  { %736 = vmatpush.bf16.msra.mxu0 %v1949_v12  ;;  %v1509_v35 = vld [vmem:[%s2717_s0 + $0x1c] sm:$0xf0]  ;;  %v1907_v37 = vld [vmem:[%s2717_s0 + $0x20] sm:$0xf0]  ;;  %v1904_v38 = vld [vmem:[%s2717_s0 + $0xc] sm:$0xf]  ;;  %v1508_v42 = vor.u32 %v1906_v33, %v1507_v32 }
   0xf   :  { %779 = vmatpush.bf16.msra.mxu1 %v1957_v13  ;;  %v1517_v39 = vld [vmem:[%s2717_s0 + $0x24] sm:$0xf0]  ;;  %v1993_v40 = vld [vmem:[%s2715_s1 + $0x180] sm:$0xff]  ;;  %v1512_v43 = vor.u32 %v1903_v34, %v1509_v35  ;;  %v1516_v44 = vor.u32 %v1907_v37, %v1515_v36  ;;  %v1991_v48 = vld [vmem:[%s2715_s1 + $0x170] sm:$0xff] }
  0x10   :  { %822 = vmatpush.bf16.msra.mxu2 %v1965_v14  ;;  %v1520_v45 = vor.u32 %v1904_v38, %v1517_v39  ;;  %v1982_v49 = vld [vmem:[%s2715_s1 + $0x128] sm:$0xff]  ;;  %v1981_v51 = vld [vmem:[%s2715_s1 + $0x120] sm:$0xff]  ;;  %v1535_v52 = vld [vmem:[%s2717_s0 + $0x38] sm:$0xf] }
  0x11   :  { %865 = vmatpush.bf16.msra.mxu3 %v1973_v15  ;;  %v1990_v50 = vld [vmem:[%s2715_s1 + $0x168] sm:$0xff]  ;;  %v1913_v53 = vld [vmem:[%s2717_s0 + $0x50] sm:$0xf0]  ;;  %v1910_v54 = vld [vmem:[%s2717_s0 + $0x3c] sm:$0xf] }
  0x12   :  { %737 = vmatpush.bf16.msra.mxu0 %v1948_v16  ;;  %v1537_v55 = vld [vmem:[%s2717_s0 + $0x54] sm:$0xf0]  ;;  %v1543_v56 = vld [vmem:[%s2717_s0 + $0x40] sm:$0xf]  ;;  %v1914_v57 = vld [vmem:[%s2717_s0 + $0x58] sm:$0xf0]  ;;  %v1536_v61 = vor.u32 %v1913_v53, %v1535_v52 }
  0x13   :  { %780 = vmatpush.bf16.msra.mxu1 %v1956_v17  ;;  %v1911_v58 = vld [vmem:[%s2717_s0 + $0x44] sm:$0xf]  ;;  %v1545_v59 = vld [vmem:[%s2717_s0 + $0x5c] sm:$0xf0]  ;;  %v1540_v62 = vor.u32 %v1910_v54, %v1537_v55  ;;  %v1544_v63 = vor.u32 %v1914_v57, %v1543_v56  ;;  %v1980_v1 = vld [vmem:[%s2715_s1 + $0x118] sm:$0xff] }
  0x14   :  { %823 = vmatpush.bf16.msra.mxu2 %v1964_v18  ;;  %v1989_v60 = vld [vmem:[%s2715_s1 + $0x160] sm:$0xff]  ;;  %v1548_v0 = vor.u32 %v1911_v58, %v1545_v59  ;;  %v1988_v2 = vld [vmem:[%s2715_s1 + $0x158] sm:$0xff]  ;;  %v1563_v3 = vld [vmem:[%s2717_s0 + $0x70] sm:$0xf] }
  0x15   :  { %866 = vmatpush.bf16.msra.mxu3 %v1972_v19  ;;  %v1920_v4 = vld [vmem:[%s2717_s0 + $0x88] sm:$0xf0]  ;;  %v1917_v5 = vld [vmem:[%s2717_s0 + $0x74] sm:$0xf]  ;;  %v1565_v6 = vld [vmem:[%s2717_s0 + $0x8c] sm:$0xf0] }
  0x16   :  { %738 = vmatpush.bf16.msra.mxu0 %v1947_v20  ;;  %v1571_v7 = vld [vmem:[%s2717_s0 + $0x78] sm:$0xf]  ;;  %v1921_v8 = vld [vmem:[%s2717_s0 + $0x90] sm:$0xf0]  ;;  %v1918_v9 = vld [vmem:[%s2717_s0 + $0x7c] sm:$0xf]  ;;  %v1564_v11 = vor.u32 %v1920_v4, %v1563_v3  ;;  %v1568_v12 = vor.u32 %v1917_v5, %v1565_v6 }
  0x17   :  { %781 = vmatpush.bf16.msra.mxu1 %v1955_v21  ;;  %v1573_v10 = vld [vmem:[%s2717_s0 + $0x94] sm:$0xf0]  ;;  %v1572_v13 = vor.u32 %v1921_v8, %v1571_v7  ;;  %v1979_v15 = vld [vmem:[%s2715_s1 + $0x110] sm:$0xff]  ;;  %v1591_v17 = vld [vmem:[%s2717_s0 + $0xa8] sm:$0xf] }
  0x18   :  { %824 = vmatpush.bf16.msra.mxu2 %v1963_v22  ;;  %v1576_v14 = vor.u32 %v1918_v9, %v1573_v10  ;;  %v1987_v16 = vld [vmem:[%s2715_s1 + $0x150] sm:$0xff]  ;;  %v1927_v18 = vld [vmem:[%s2717_s0 + $0xc0] sm:$0xf0]  ;;  %v1924_v19 = vld [vmem:[%s2717_s0 + $0xac] sm:$0xf] }
  0x19   :  { %867 = vmatpush.bf16.msra.mxu3 %v1971_v23  ;;  %v1593_v20 = vld [vmem:[%s2717_s0 + $0xc4] sm:$0xf0]  ;;  %v1599_v21 = vld [vmem:[%s2717_s0 + $0xb0] sm:$0xf]  ;;  %v1928_v22 = vld [vmem:[%s2717_s0 + $0xc8] sm:$0xf0] }
  0x1a   :  { %739 = vmatpush.bf16.msra.mxu0 %v1946_v24  ;;  %v1925_v23 = vld [vmem:[%s2717_s0 + $0xb4] sm:$0xf]  ;;  %v1601_v24 = vld [vmem:[%s2717_s0 + $0xcc] sm:$0xf0]  ;;  %v1934_v32 = vld [vmem:[%s2717_s0 + $0xf8] sm:$0xf0] }
  0x1b   :  { %782 = vmatpush.bf16.msra.mxu1 %v1954_v25  ;;  %v1592_v25 = vor.u32 %v1927_v18, %v1591_v17  ;;  %v1931_v33 = vld [vmem:[%s2717_s0 + $0xe4] sm:$0xf]  ;;  %v1621_v34 = vld [vmem:[%s2717_s0 + $0xfc] sm:$0xf0]  ;;  %v1627_v35 = vld [vmem:[%s2717_s0 + $0xe8] sm:$0xf] }
  0x1c   :  { %825 = vmatpush.bf16.msra.mxu2 %v1962_v26  ;;  %v1596_v26 = vor.u32 %v1924_v19, %v1593_v20  ;;  %v1935_v36 = vld [vmem:[%s2717_s0 + $0x100] sm:$0xf0]  ;;  %v1932_v37 = vld [vmem:[%s2717_s0 + $0xec] sm:$0xf]  ;;  %v1629_v38 = vld [vmem:[%s2717_s0 + $0x104] sm:$0xf0] }
  0x1d   :  { %868 = vmatpush.bf16.msra.mxu3 %v1970_v27  ;;  %v1600_v27 = vor.u32 %v1928_v22, %v1599_v21  ;;  %v1657_v52 = vld [vmem:[%s2717_s0 + $0x13c] sm:$0xf0]  ;;  %v77_v57 = vld [vmem:[%s2717_s0 + $0x150] sm:$0xff]  ;;  %v78_v58 = vld [vmem:[%s2717_s0 + $0x158] sm:$0xff] }
  0x1e   :  { %740 = vmatpush.bf16.msra.mxu0 %v1945_v28  ;;  %v1604_v28 = vor.u32 %v1925_v23, %v1601_v24  ;;  %v319_v59 = vunpack.c.l.b16 %v77_v57  ;;  %v1523_v3 = vld [vmem:[%s2717_s0 + $0x10] sm:$0xf]  ;;  %v1908_v5 = vld [vmem:[%s2717_s0 + $0x28] sm:$0xf0]  ;;  %v1905_v6 = vld [vmem:[%s2717_s0 + $0x14] sm:$0xf] }
  0x1f   :  { %783 = vmatpush.bf16.msra.mxu1 %v1953_v29  ;;  %v1978_v29 = vld [vmem:[%s2715_s1 + $0x108] sm:$0xff]  ;;  %v1049_v4 = vld [vmem:[%s2718_s3 + $0x10] sm:$0xf]  ;;  %v1531_v8 = vld [vmem:[%s2717_s0 + $0x18] sm:$0xf]  ;;  %v1524_v10 = vor.u32 %v1908_v5, %v1523_v3 }
  0x20   :  { %826 = vmatpush.bf16.msra.mxu2 %v1961_v30  ;;  %v1986_v30 = vld [vmem:[%s2715_s1 + $0x148] sm:$0xff]  ;;  %v1525_v7 = vld [vmem:[%s2717_s0 + $0x2c] sm:$0xf0]  ;;  %v1909_v9 = vld [vmem:[%s2717_s0 + $0x30] sm:$0xf0] }
  0x21   :  { %869 = vmatpush.bf16.msra.mxu3 %v1969_v31  ;;  %741 = vmatmul.bf16.vlgmr.msra.gmra.mxu0 %v1508_v42  ;;  %v1619_v31 = vld [vmem:[%s2717_s0 + $0xe0] sm:$0xf]  ;;  %v1632_v42 = vor.u32 %v1932_v37, %v1629_v38  ;;  %v1559_v18 = vld [vmem:[%s2717_s0 + $0x50] sm:$0xf]  ;;  %v1916_v19 = vld [vmem:[%s2717_s0 + $0x68] sm:$0xf0] }
  0x22   :  { %905 = vmatpush.bf16.msrb.mxu0 %v1984_v41  ;;  %784 = vmatmul.bf16.vlgmr.msra.gmra.mxu1 %v1512_v43  ;;  %v1620_v39 = vor.u32 %v1934_v32, %v1619_v31  ;;  %v1628_v41 = vor.u32 %v1935_v36, %v1627_v35  ;;  %v1977_v43 = vld [vmem:[%s2715_s1 + $0x100] sm:$0xff]  ;;  %v1560_v24 = vor.u32 %v1916_v19, %v1559_v18  ;;  %v1922_v35 = vld [vmem:[%s2717_s0 + $0x98] sm:$0xf0]  ;;  %v1587_v38 = vld [vmem:[%s2717_s0 + $0x88] sm:$0xf] }
  0x23   :  { %827 = vmatmul.bf16.vlgmr.msra.gmra.mxu2 %v1516_v44  ;;  %948 = vmatpush.bf16.msrb.mxu1 %v1992_v46  ;;  %v1985_v44 = vld [vmem:[%s2715_s1 + $0x140] sm:$0xff]  ;;  %v1941_v46 = vld [vmem:[%s2717_s0 + $0x130] sm:$0xf0] }
  0x24   :  { %998 = vmatpush.bf16.msrb.mxu2 %v1993_v40  ;;  %870 = vmatmul.bf16.vlgmr.msra.gmra.mxu3 %v1520_v45  ;;  %v1624_v40 = vor.u32 %v1931_v33, %v1621_v34  ;;  %v1647_v45 = vld [vmem:[%s2717_s0 + $0x118] sm:$0xf]  ;;  %v2424_v17 = vld [vmem:[%s2716_s2] ss:$0 sm:$0xff]  ;;  %v1919_v36 = vld [vmem:[%s2717_s0 + $0x84] sm:$0xf] }
  0x25   :  { %v1648_v53 = vor.u32 %v1941_v46, %v1647_v45  ;;  %1876 = vmatpush.msk.msrb.mxu3 %vm1094_vm0, %v1049_v4  ;;  %v1579_v34 = vld [vmem:[%s2717_s0 + $0x80] sm:$0xf] }
  0x26   :  { %906 = vmatpush.bf16.msrb.mxu0 %v1983_v47  ;;  %v1938_v47 = vld [vmem:[%s2717_s0 + $0x11c] sm:$0xf]  ;;  %v1581_v37 = vld [vmem:[%s2717_s0 + $0x9c] sm:$0xf0] }
  0x27   :  { %949 = vmatpush.bf16.msrb.mxu1 %v1991_v48  ;;  %v1649_v48 = vld [vmem:[%s2717_s0 + $0x134] sm:$0xf0] }
  0x28   :  { %v1652_v54 = vor.u32 %v1938_v47, %v1649_v48 }
  0x2a   :  { %907 = vmatpush.bf16.msrb.mxu0 %v1982_v49  ;;  %v1655_v49 = vld [vmem:[%s2717_s0 + $0x120] sm:$0xf] }
  0x2b   :  { %950 = vmatpush.bf16.msrb.mxu1 %v1990_v50  ;;  %v1942_v50 = vld [vmem:[%s2717_s0 + $0x138] sm:$0xf0] }
  0x2c   :  { %v1656_v55 = vor.u32 %v1942_v50, %v1655_v49  ;;  %v1048_v50 = vld [vmem:[%s2718_s3 + $0x8] sm:$0xff] }
  0x2d   :  { %1112 = vmatpush.msrb.mxu3 %v1048_v50  ;;  %v1663_v50 = vld [vmem:[%s2717_s0 + $0x128] sm:$0xf] }
  0x2e   :  { %908 = vmatpush.bf16.msrb.mxu0 %v1981_v51  ;;  %v1939_v51 = vld [vmem:[%s2717_s0 + $0x124] sm:$0xf] }
  0x2f   :  { %951 = vmatpush.bf16.msrb.mxu1 %v1989_v60  ;;  %v1660_v56 = vor.u32 %v1939_v51, %v1657_v52  ;;  %v320_v60 = vunpack.c.h.b16 %v77_v57 }
  0x31   :  { %746 = vmatmul.bf16.gmra.mxu0 %v1536_v61  ;;  %v321_v61 = vunpack.c.l.b16 %v78_v58 }
  0x32   :  { %789 = vmatmul.bf16.gmra.mxu1 %v1540_v62  ;;  %909 = vmatpush.bf16.msrb.mxu0 %v1980_v1  ;;  %v322_v62 = vunpack.c.h.b16 %v78_v58  ;;  %v1607_v58 = vld [vmem:[%s2717_s0 + $0xb8] sm:$0xf] }
  0x33   :  { %832 = vmatmul.bf16.gmra.mxu2 %v1544_v63  ;;  %952 = vmatpush.bf16.msrb.mxu1 %v1988_v2  ;;  %v368_v63 = vpack.c.b16 %v319_v59, %v319_v59  ;;  %v370_v1 = vpack.c.b16 %v321_v61, %v321_v61  ;;  %v1929_v59 = vld [vmem:[%s2717_s0 + $0xd0] sm:$0xf0]  ;;  %v1609_v61 = vld [vmem:[%s2717_s0 + $0xd4] sm:$0xf0] }
  0x34   :  { %875 = vmatmul.bf16.gmra.mxu3 %v1548_v0  ;;  %v369_v0 = vpack.c.b16 %v320_v60, %v320_v60  ;;  %v371_v2 = vpack.c.b16 %v322_v62, %v322_v62  ;;  %v1926_v60 = vld [vmem:[%s2717_s0 + $0xbc] sm:$0xf]  ;;  %v1615_v62 = vld [vmem:[%s2717_s0 + $0xc0] sm:$0xf] }
  0x35   :  { %v1612_v3 = vor.u32 %v1926_v60, %v1609_v61 }
  0x36   :  { %910 = vmatpush.bf16.msrb.mxu0 %v1979_v15  ;;  %v1912_v15 = vld [vmem:[%s2717_s0 + $0x4c] sm:$0xf] }
  0x37   :  { %953 = vmatpush.bf16.msrb.mxu1 %v1987_v16  ;;  %v1553_v16 = vld [vmem:[%s2717_s0 + $0x64] sm:$0xf0] }
  0x38   :  { %v1556_v21 = vor.u32 %v1912_v15, %v1553_v16 }
  0x3a   :  { %911 = vmatpush.bf16.msrb.mxu0 %v1978_v29 }
  0x3b   :  { %954 = vmatpush.bf16.msrb.mxu1 %v1986_v30 }
  0x3e   :  { %912 = vmatpush.bf16.msrb.mxu0 %v1977_v43  ;;  %v1584_v43 = vor.u32 %v1919_v36, %v1581_v37 }
  0x3f   :  { %955 = vmatpush.bf16.msrb.mxu1 %v1985_v44 }
  0x41   :  { %751 = vmatmul.bf16.gmra.mxu0 %v1564_v11  ;;  %v1528_v11 = vor.u32 %v1905_v6, %v1525_v7 }
  0x42   :  { %794 = vmatmul.bf16.gmra.mxu1 %v1568_v12  ;;  %v1532_v12 = vor.u32 %v1909_v9, %v1531_v8 }
  0x43   :  { %837 = vmatmul.bf16.gmra.mxu2 %v1572_v13  ;;  %v1551_v13 = vld [vmem:[%s2717_s0 + $0x48] sm:$0xf] }
  0x44   :  { %880 = vmatmul.bf16.gmra.mxu3 %v1576_v14  ;;  %v1915_v14 = vld [vmem:[%s2717_s0 + $0x60] sm:$0xf0] }
  0x45   :  { %v1552_v20 = vor.u32 %v1915_v14, %v1551_v13 }
  0x51   :  { %756 = vmatmul.bf16.gmra.mxu0 %v1592_v25 }
  0x52   :  { %799 = vmatmul.bf16.gmra.mxu1 %v1596_v26 }
  0x53   :  { %842 = vmatmul.bf16.gmra.mxu2 %v1600_v27 }
  0x54   :  { %885 = vmatmul.bf16.gmra.mxu3 %v1604_v28 }
  0x61   :  { %761 = vmatmul.bf16.gmra.mxu0 %v1620_v39  ;;  %v1923_v39 = vld [vmem:[%s2717_s0 + $0xa0] sm:$0xf0] }
  0x62   :  { %804 = vmatmul.bf16.gmra.mxu1 %v1624_v40  ;;  %v1588_v47 = vor.u32 %v1923_v39, %v1587_v38 }
  0x63   :  { %847 = vmatmul.bf16.gmra.mxu2 %v1628_v41 }
  0x64   :  { %890 = vmatmul.bf16.gmra.mxu3 %v1632_v42  ;;  %v1580_v42 = vor.u32 %v1922_v35, %v1579_v34 }
  0x71   :  { %766 = vmatmul.bf16.gmra.mxu0 %v1648_v53 }
  0x72   :  { %809 = vmatmul.bf16.gmra.mxu1 %v1652_v54 }
  0x73   :  { %852 = vmatmul.bf16.gmra.mxu2 %v1656_v55 }
  0x74   :  { %895 = vmatmul.bf16.gmra.mxu3 %v1660_v56 }
  0x81   :  { %771 = vmatmul.bf16.gmra.mxu0 %v368_v63  ;;  %v1930_v63 = vld [vmem:[%s2717_s0 + $0xd8] sm:$0xf0] }
  0x82   :  { %814 = vmatmul.bf16.gmra.mxu1 %v369_v0  ;;  %v1616_v7 = vor.u32 %v1930_v63, %v1615_v62 }
  0x83   :  { %857 = vmatmul.bf16.gmra.mxu2 %v370_v1 }
  0x84   :  { %900 = vmatmul.bf16.gmra.mxu3 %v371_v2  ;;  %v1608_v2 = vor.u32 %v1929_v59, %v1607_v58 }
  0x91   :  { %913 = vmatmul.bf16.vlgmr.msrb.gmra.mxu0 %v1524_v10 }
  0x92   :  { %956 = vmatmul.bf16.vlgmr.msrb.gmra.mxu1 %v1528_v11 }
  0x93   :  { %1869 = vmatmul.msk.bf16.vlgmr.msrb.gmra.mxu2 %vm711_vm1, %v1532_v12 }
  0x9e   :  { %v742_v22 = vpop.f32.mrf.mxu0 }
  0x9f   :  { %v785_v23 = vpop.f32.mrf.mxu1  ;;  %v743_v25 = vadd.f32 %v2424_v17, %v742_v22  ;;  %v1933_v22 = vld [vmem:[%s2717_s0 + $0xf4] sm:$0xf] }
  0xa1   :  { %v786_v26 = vadd.f32 %v785_v23, %v743_v25  ;;  %918 = vmatmul.bf16.gmra.mxu0 %v1552_v20  ;;  %v1635_v20 = vld [vmem:[%s2717_s0 + $0xf0] sm:$0xf]  ;;  %v1937_v25 = vld [vmem:[%s2717_s0 + $0x110] sm:$0xf0] }
  0xa2   :  { %961 = vmatmul.bf16.gmra.mxu1 %v1556_v21  ;;  %v1936_v21 = vld [vmem:[%s2717_s0 + $0x108] sm:$0xf0]  ;;  %v1637_v23 = vld [vmem:[%s2717_s0 + $0x10c] sm:$0xf0] }
  0xa3   :  { %1870 = vmatmul.msk.bf16.gmra.mxu2 %vm711_vm1, %v1560_v24  ;;  %v1643_v24 = vld [vmem:[%s2717_s0 + $0xf8] sm:$0xf] }
  0xa4   :  { %v1644_v35 = vor.u32 %v1937_v25, %v1643_v24 }
  0xa6   :  { %v828_v27 = vpop.f32.mrf.mxu2  ;;  %v744_v30 = vpop.f32.mrf.mxu0 }
  0xa7   :  { %v2434_v28 = vpop.f32.mrf.mxu3  ;;  %v2436_v29 = vadd.f32 %v828_v27, %v786_v26  ;;  %v787_v31 = vpop.f32.mrf.mxu1  ;;  %v745_v32 = vadd.f32 %v2424_v17, %v744_v30  ;;  %v1636_v30 = vor.u32 %v1936_v21, %v1635_v20 }
  0xa9   :  { %v788_v33 = vadd.f32 %v787_v31, %v745_v32  ;;  %v1640_v31 = vor.u32 %v1933_v22, %v1637_v23 }
  0xae   :  { %v830_v40 = vpop.f32.mrf.mxu2  ;;  %v747_v45 = vpop.f32.mrf.mxu0 }
  0xaf   :  { %v2457_v41 = vpop.f32.mrf.mxu3  ;;  %v2459_v44 = vadd.f32 %v830_v40, %v788_v33  ;;  %v790_v46 = vpop.f32.mrf.mxu1  ;;  %v748_v48 = vadd.f32 %v2424_v17, %v747_v45 }
  0xb1   :  { %v791_v49 = vadd.f32 %v790_v46, %v748_v48  ;;  %923 = vmatmul.bf16.gmra.mxu0 %v1580_v42  ;;  %v1047_v46 = vld [vmem:[%s2718_s3] sm:$0xff] }
  0xb2   :  { %966 = vmatmul.bf16.gmra.mxu1 %v1584_v43  ;;  %1113 = vmatpush.msrb.mxu3 %v1047_v46 }
  0xb3   :  { %1871 = vmatmul.msk.bf16.gmra.mxu2 %vm711_vm1, %v1588_v47 }
  0xb6   :  { %v833_v51 = vpop.f32.mrf.mxu2  ;;  %v749_v54 = vpop.f32.mrf.mxu0 }
  0xb7   :  { %v2466_v52 = vpop.f32.mrf.mxu3  ;;  %v2468_v53 = vadd.f32 %v833_v51, %v791_v49  ;;  %v792_v55 = vpop.f32.mrf.mxu1  ;;  %v750_v56 = vadd.f32 %v2424_v17, %v749_v54  ;;  %v1943_v51 = vld [vmem:[%s2717_s0 + $0x140] sm:$0xf0]  ;;  %v1940_v54 = vld [vmem:[%s2717_s0 + $0x12c] sm:$0xf] }
  0xb8   :  { %v1664_v60 = vor.u32 %v1943_v51, %v1663_v50 }
  0xb9   :  { %v793_v57 = vadd.f32 %v792_v55, %v750_v56  ;;  %v1665_v55 = vld [vmem:[%s2717_s0 + $0x144] sm:$0xf0]  ;;  %v1671_v56 = vld [vmem:[%s2717_s0 + $0x130] sm:$0xf] }
  0xba   :  { %v1668_v61 = vor.u32 %v1940_v54, %v1665_v55 }
  0xbe   :  { %v835_v0 = vpop.f32.mrf.mxu2  ;;  %v752_v5 = vpop.f32.mrf.mxu0 }
  0xbf   :  { %v878_v1 = vpop.f32.mrf.mxu3  ;;  %v836_v4 = vadd.f32 %v835_v0, %v793_v57  ;;  %v795_v6 = vpop.f32.mrf.mxu1  ;;  %v753_v8 = vadd.f32 %v2424_v17, %v752_v5  ;;  %v1944_v57 = vld [vmem:[%s2717_s0 + $0x148] sm:$0xf0] }
  0xc1   :  { %v2490_v9 = vadd.f32 %v878_v1, %v836_v4  ;;  %v796_v10 = vadd.f32 %v795_v6, %v753_v8  ;;  %928 = vmatmul.bf16.gmra.mxu0 %v1608_v2  ;;  %v1672_v1 = vor.u32 %v1944_v57, %v1671_v56 }
  0xc2   :  { %971 = vmatmul.bf16.gmra.mxu1 %v1612_v3 }
  0xc3   :  { %1872 = vmatmul.msk.bf16.gmra.mxu2 %vm711_vm1, %v1616_v7 }
  0xc6   :  { %v838_v11 = vpop.f32.mrf.mxu2  ;;  %v754_v14 = vpop.f32.mrf.mxu0 }
  0xc7   :  { %v881_v12 = vpop.f32.mrf.mxu3  ;;  %v839_v13 = vadd.f32 %v838_v11, %v796_v10  ;;  %v797_v15 = vpop.f32.mrf.mxu1  ;;  %v755_v16 = vadd.f32 %v2424_v17, %v754_v14  ;;  %v79_v11 = vld [vmem:[%s2717_s0 + $0x160] sm:$0xff] }
  0xc9   :  { %v2494_v18 = vadd.f32 %v881_v12, %v839_v13  ;;  %v798_v19 = vadd.f32 %v797_v15, %v755_v16  ;;  %v80_v13 = vld [vmem:[%s2717_s0 + $0x168] sm:$0xf]  ;;  %v323_v16 = vunpack.c.l.b16 %v79_v11 }
  0xca   :  { %v325_v20 = vunpack.c.l.b16 %v80_v13 }
  0xcb   :  { %v372_v23 = vpack.c.b16 %v323_v16, %v323_v16 }
  0xce   :  { %v840_v26 = vpop.f32.mrf.mxu2  ;;  %v757_v33 = vpop.f32.mrf.mxu0 }
  0xcf   :  { %v883_v27 = vpop.f32.mrf.mxu3  ;;  %v841_v32 = vadd.f32 %v840_v26, %v798_v19  ;;  %v800_v34 = vpop.f32.mrf.mxu1  ;;  %v758_v36 = vadd.f32 %v2424_v17, %v757_v33  ;;  %v324_v19 = vunpack.c.h.b16 %v79_v11 }
  0xd1   :  { %v2515_v37 = vadd.f32 %v883_v27, %v841_v32  ;;  %v801_v38 = vadd.f32 %v800_v34, %v758_v36  ;;  %933 = vmatmul.bf16.gmra.mxu0 %v1636_v30  ;;  %v373_v24 = vpack.c.b16 %v324_v19, %v324_v19  ;;  %v374_v30 = vpack.c.b16 %v325_v20, %v325_v20 }
  0xd2   :  { %976 = vmatmul.bf16.gmra.mxu1 %v1640_v31 }
  0xd3   :  { %1873 = vmatmul.msk.bf16.gmra.mxu2 %vm711_vm1, %v1644_v35 }
  0xd6   :  { %v843_v39 = vpop.f32.mrf.mxu2  ;;  %v759_v43 = vpop.f32.mrf.mxu0 }
  0xd7   :  { %v886_v40 = vpop.f32.mrf.mxu3  ;;  %v844_v42 = vadd.f32 %v843_v39, %v801_v38  ;;  %v802_v45 = vpop.f32.mrf.mxu1  ;;  %v760_v47 = vadd.f32 %v2424_v17, %v759_v43 }
  0xd9   :  { %v2522_v48 = vadd.f32 %v886_v40, %v844_v42  ;;  %v803_v49 = vadd.f32 %v802_v45, %v760_v47 }
  0xde   :  { %v845_v58 = vpop.f32.mrf.mxu2  ;;  %v762_v63 = vpop.f32.mrf.mxu0 }
  0xdf   :  { %v888_v59 = vpop.f32.mrf.mxu3  ;;  %v846_v62 = vadd.f32 %v845_v58, %v803_v49  ;;  %v805_v0 = vpop.f32.mrf.mxu1  ;;  %v763_v2 = vadd.f32 %v2424_v17, %v762_v63 }
  0xe1   :  { %v2543_v3 = vadd.f32 %v888_v59, %v846_v62  ;;  %v806_v4 = vadd.f32 %v805_v0, %v763_v2  ;;  %938 = vmatmul.bf16.gmra.mxu0 %v1664_v60  ;;  %v872_v0 = vadd.f32 %v2434_v28, %v2436_v29  ;;  %v877_v28 = vadd.f32 %v2466_v52, %v2468_v53 }
  0xe2   :  { %981 = vmatmul.bf16.gmra.mxu1 %v1668_v61 }
  0xe3   :  { %1874 = vmatmul.msk.bf16.gmra.mxu2 %vm711_vm1, %v1672_v1 }
  0xe6   :  { %v848_v5 = vpop.f32.mrf.mxu2  ;;  %v764_v8 = vpop.f32.mrf.mxu0 }
  0xe7   :  { %v891_v6 = vpop.f32.mrf.mxu3  ;;  %v849_v7 = vadd.f32 %v848_v5, %v806_v4  ;;  %v807_v10 = vpop.f32.mrf.mxu1  ;;  %v765_v12 = vadd.f32 %v2424_v17, %v764_v8 }
  0xe9   :  { %v2553_v14 = vadd.f32 %v891_v6, %v849_v7  ;;  %v808_v15 = vadd.f32 %v807_v10, %v765_v12  ;;  %v874_v6 = vadd.f32 %v2457_v41, %v2459_v44 }
  0xee   :  { %v850_v21 = vpop.f32.mrf.mxu2  ;;  %v767_v26 = vpop.f32.mrf.mxu0 }
  0xef   :  { %v893_v22 = vpop.f32.mrf.mxu3  ;;  %v851_v25 = vadd.f32 %v850_v21, %v808_v15  ;;  %v810_v27 = vpop.f32.mrf.mxu1  ;;  %v768_v31 = vadd.f32 %v2424_v17, %v767_v26 }
  0xf1   :  { %v2556_v32 = vadd.f32 %v893_v22, %v851_v25  ;;  %v811_v33 = vadd.f32 %v810_v27, %v768_v31  ;;  %943 = vmatmul.bf16.gmra.mxu0 %v372_v23 }
  0xf2   :  { %986 = vmatmul.bf16.gmra.mxu1 %v373_v24 }
  0xf3   :  { %1875 = vmatmul.msk.bf16.gmra.mxu2 %vm711_vm1, %v374_v30 }
  0xf6   :  { %v853_v34 = vpop.f32.mrf.mxu2  ;;  %v769_v38 = vpop.f32.mrf.mxu0 }
  0xf7   :  { %v896_v35 = vpop.f32.mrf.mxu3  ;;  %v854_v36 = vadd.f32 %v853_v34, %v811_v33  ;;  %v812_v39 = vpop.f32.mrf.mxu1  ;;  %v770_v40 = vadd.f32 %v2424_v17, %v769_v38 }
  0xf9   :  { %v2560_v42 = vadd.f32 %v896_v35, %v854_v36  ;;  %v813_v43 = vadd.f32 %v812_v39, %v770_v40 }
  0xfe   :  { %v855_v45 = vpop.f32.mrf.mxu2  ;;  %v772_v49 = vpop.f32.mrf.mxu0 }
  0xff   :  { %v898_v46 = vpop.f32.mrf.mxu3  ;;  %v856_v47 = vadd.f32 %v855_v45, %v813_v43  ;;  %v815_v50 = vpop.f32.mrf.mxu1  ;;  %v773_v51 = vadd.f32 %v2424_v17, %v772_v49 }
 0x101   :  { %v2563_v54 = vadd.f32 %v898_v46, %v856_v47  ;;  %v816_v55 = vadd.f32 %v815_v50, %v773_v51 }
 0x106   :  { %v858_v56 = vpop.f32.mrf.mxu2  ;;  %v774_v59 = vpop.f32.mrf.mxu0 }
 0x107   :  { %v901_v57 = vpop.f32.mrf.mxu3  ;;  %v859_v58 = vadd.f32 %v858_v56, %v816_v55  ;;  %v817_v60 = vpop.f32.mrf.mxu1 }
 0x109   :  { %v2565_v61 = vadd.f32 %v901_v57, %v859_v58 }
 0x10e   :  { %v860_v62 = vpop.f32.mrf.mxu2  ;;  %v914_v1 = vpop.f32.mrf.mxu0 }
 0x10f   :  { %v903_v63 = vpop.f32.mrf.mxu3  ;;  %v957_v2 = vpop.f32.mrf.mxu1  ;;  %v915_v4 = vadd.f32 %v914_v1, %v872_v0 }
 0x111   :  { %v958_v5 = vadd.f32 %v957_v2, %v915_v4 }
 0x116   :  { %v1000_v17 = vpop.f32.mrf.mxu2  ;;  %v916_v8 = vpop.f32.mrf.mxu0 }
 0x117   :  { %v1001_v7 = vadd.f32 %v1000_v17, %v958_v5  ;;  %v959_v10 = vpop.f32.mrf.mxu1  ;;  %v917_v12 = vadd.f32 %v916_v8, %v874_v6 }
 0x119   :  { %v1034_v11 = vmax.f32 %v1001_v7, 0.0  ;;  %v960_v13 = vadd.f32 %v959_v10, %v917_v12 }
 0x11b   :  { %1877 = vmatmul.msk.f32.vlgmr.msrb.gmra.mxu3 %vm1054_vm2, %v1034_v11 }
 0x11e   :  { %v1002_v15 = vpop.f32.mrf.mxu2  ;;  %v919_v16 = vpop.f32.mrf.mxu0 }
 0x11f   :  { %v1003_v29 = vadd.f32 %v1002_v15, %v960_v13  ;;  %v962_v19 = vpop.f32.mrf.mxu1  ;;  %v920_v21 = vadd.f32 %v919_v16, %v877_v28 }
 0x121   :  { %v1035_v20 = vmax.f32 %v1003_v29, 0.0  ;;  %v963_v41 = vadd.f32 %v962_v19, %v920_v21 }
 0x123   :  { %1878 = vmatmul.msk.f32.gmra.mxu3 %vm1054_vm2, %v1035_v20 }
 0x126   :  { %v1005_v44 = vpop.f32.mrf.mxu2  ;;  %v921_v23 = vpop.f32.mrf.mxu0 }
 0x127   :  { %v1006_v22 = vadd.f32 %v1005_v44, %v963_v41  ;;  %v964_v24 = vpop.f32.mrf.mxu1  ;;  %v922_v26 = vadd.f32 %v921_v23, %v2490_v9 }
 0x129   :  { %v1036_v25 = vmax.f32 %v1006_v22, 0.0  ;;  %v965_v27 = vadd.f32 %v964_v24, %v922_v26 }
 0x12b   :  { %1879 = vmatmul.msk.f32.gmra.mxu3 %vm1054_vm2, %v1036_v25 }
 0x12e   :  { %v1007_v30 = vpop.f32.mrf.mxu2  ;;  %v924_v53 = vpop.f32.mrf.mxu0 }
 0x12f   :  { %v1008_v52 = vadd.f32 %v1007_v30, %v965_v27  ;;  %v967_v31 = vpop.f32.mrf.mxu1  ;;  %v925_v34 = vadd.f32 %v924_v53, %v2494_v18 }
 0x131   :  { %v1037_v33 = vmax.f32 %v1008_v52, 0.0  ;;  %v968_v35 = vadd.f32 %v967_v31, %v925_v34 }
 0x133   :  { %1880 = vmatmul.msk.f32.gmra.mxu3 %vm1054_vm2, %v1037_v33 }
 0x136   :  { %v1010_v36 = vpop.f32.mrf.mxu2  ;;  %v926_v39 = vpop.f32.mrf.mxu0 }
 0x137   :  { %v1011_v38 = vadd.f32 %v1010_v36, %v968_v35  ;;  %v969_v40 = vpop.f32.mrf.mxu1  ;;  %v927_v9 = vadd.f32 %v926_v39, %v2515_v37  ;;  %v2599_v35 = vld [vmem:[%s2719_s4] ss:$0 sm:$0xff] }
 0x139   :  { %v1038_v43 = vmax.f32 %v1011_v38, 0.0  ;;  %v970_v45 = vadd.f32 %v969_v40, %v927_v9 }
 0x13b   :  { %1881 = vmatmul.msk.f32.gmra.mxu3 %vm1054_vm2, %v1038_v43 }
 0x13e   :  { %v1012_v46 = vpop.f32.mrf.mxu2  ;;  %v929_v49 = vpop.f32.mrf.mxu0 }
 0x13f   :  { %v1013_v47 = vadd.f32 %v1012_v46, %v970_v45  ;;  %v972_v50 = vpop.f32.mrf.mxu1  ;;  %v930_v18 = vadd.f32 %v929_v49, %v2522_v48 }
 0x141   :  { %v1039_v51 = vmax.f32 %v1013_v47, 0.0  ;;  %v973_v55 = vadd.f32 %v972_v50, %v930_v18 }
 0x143   :  { %1882 = vmatmul.msk.f32.gmra.mxu3 %vm1054_vm2, %v1039_v51 }
 0x146   :  { %v1015_v56 = vpop.f32.mrf.mxu2  ;;  %v931_v58 = vpop.f32.mrf.mxu0 }
 0x147   :  { %v1016_v57 = vadd.f32 %v1015_v56, %v973_v55  ;;  %v974_v59 = vpop.f32.mrf.mxu1  ;;  %v932_v37 = vadd.f32 %v931_v58, %v2543_v3 }
 0x149   :  { %v1040_v60 = vmax.f32 %v1016_v57, 0.0  ;;  %v975_v62 = vadd.f32 %v974_v59, %v932_v37 }
 0x14b   :  { %1883 = vmatmul.msk.f32.gmra.mxu3 %vm1054_vm2, %v1040_v60 }
 0x14e   :  { %v1017_v63 = vpop.f32.mrf.mxu2  ;;  %v934_v1 = vpop.f32.mrf.mxu0 }
 0x14f   :  { %v1018_v0 = vadd.f32 %v1017_v63, %v975_v62  ;;  %v977_v2 = vpop.f32.mrf.mxu1  ;;  %v935_v48 = vadd.f32 %v934_v1, %v2553_v14 }
 0x151   :  { %v1041_v4 = vmax.f32 %v1018_v0, 0.0  ;;  %v978_v5 = vadd.f32 %v977_v2, %v935_v48 }
 0x153   :  { %1884 = vmatmul.msk.f32.gmra.mxu3 %vm1054_vm2, %v1041_v4 }
 0x156   :  { %v1020_v17 = vpop.f32.mrf.mxu2  ;;  %v936_v7 = vpop.f32.mrf.mxu0 }
 0x157   :  { %v1021_v6 = vadd.f32 %v1020_v17, %v978_v5  ;;  %v979_v8 = vpop.f32.mrf.mxu1  ;;  %v937_v3 = vadd.f32 %v936_v7, %v2556_v32 }
 0x159   :  { %v1042_v10 = vmax.f32 %v1021_v6, 0.0  ;;  %v980_v11 = vadd.f32 %v979_v8, %v937_v3 }
 0x15b   :  { %1885 = vmatmul.msk.f32.gmra.mxu3 %vm1054_vm2, %v1042_v10 }
 0x15e   :  { %v1022_v12 = vpop.f32.mrf.mxu2  ;;  %v939_v15 = vpop.f32.mrf.mxu0 }
 0x15f   :  { %v1023_v13 = vadd.f32 %v1022_v12, %v980_v11  ;;  %v982_v28 = vpop.f32.mrf.mxu1  ;;  %v940_v14 = vadd.f32 %v939_v15, %v2560_v42 }
 0x161   :  { %v1043_v29 = vmax.f32 %v1023_v13, 0.0  ;;  %v983_v16 = vadd.f32 %v982_v28, %v940_v14 }
 0x163   :  { %1886 = vmatmul.msk.f32.gmra.mxu3 %vm1054_vm2, %v1043_v29 }
 0x166   :  { %v1025_v19 = vpop.f32.mrf.mxu2  ;;  %v941_v21 = vpop.f32.mrf.mxu0 }
 0x167   :  { %v1026_v20 = vadd.f32 %v1025_v19, %v983_v16  ;;  %v984_v41 = vpop.f32.mrf.mxu1  ;;  %v942_v32 = vadd.f32 %v941_v21, %v2563_v54 }
 0x169   :  { %v1044_v44 = vmax.f32 %v1026_v20, 0.0  ;;  %v985_v22 = vadd.f32 %v984_v41, %v942_v32 }
 0x16b   :  { %1887 = vmatmul.msk.f32.gmra.mxu3 %vm1054_vm2, %v1044_v44  ;;  %v12_v44 = vstv %s2721_s6 }
 0x16c   :  { %13 = vst [vmem:[#allocation2] sm:$0x1] %v12_v44 }
 0x16e   :  { %v1027_v23 = vpop.f32.mrf.mxu2  ;;  %v944_v25 = vpop.f32.mrf.mxu0 }
 0x16f   :  { %v1028_v24 = vadd.f32 %v1027_v23, %v985_v22  ;;  %v987_v26 = vpop.f32.mrf.mxu1  ;;  %v945_v42 = vadd.f32 %v944_v25, %v2565_v61  ;;  %v2605_v61 = vld [vmem:[%s2720_s5] ss:$0 sm:$0xff] }
 0x171   :  { %v1045_v27 = vmax.f32 %v1028_v24, 0.0  ;;  %v988_v30 = vadd.f32 %v987_v26, %v945_v42 }
 0x173   :  { %1888 = vmatmul.msk.f32.gmra.mxu3 %vm1054_vm2, %v1045_v27 }
 0x176   :  { %v1030_v52 = vpop.f32.mrf.mxu2  ;;  %v946_v31 = vpop.f32.mrf.mxu0 }
 0x177   :  { %v1031_v53 = vadd.f32 %v1030_v52, %v988_v30  ;;  %v989_v33 = vpop.f32.mrf.mxu1 }
 0x179   :  { %v1046_v34 = vmax.f32 %v1031_v53, 0.0 }
 0x17b   :  { %1889 = vmatmul.msk.f32.gmra.mxu3 %vm1054_vm2, %v1046_v34 }
 0x17e   :  { %v1032_v54 = vpop.f32.mrf.mxu2 }
 0x19e   :  { %v1115_v36 = vpop.f32.mrf.mxu3 }
 0x19f   :  { %v1116_v38 = vadd.f32 %v2599_v35, %v1115_v36 }
 0x1a1   :  { %v1154_v39 = vmax.f32 %v1116_v38, 0.0 }
 0x1a3   :  { %v1171_v40 = vmul.f32 %v2605_v61, %v1154_v39 }
 0x1a5   :  { %v1184_v43 = vsel %vm1054_vm2, %v1171_v40, 0.0 }
 0x1a6   :  { %v1118_v9 = vpop.f32.mrf.mxu3  ;;  %1185 = vadd.xlane.f32.xlu0 %v1184_v43  ;;  %v2648_v43 = vld [vmem:[#allocation2] ss:$0 sm:$0xff] }
 0x1a7   :  { %v1119_v45 = vadd.f32 %v2599_v35, %v1118_v9 }
 0x1a9   :  { %v1155_v46 = vmax.f32 %v1119_v45, 0.0 }
 0x1ab   :  { %v1172_v47 = vmul.f32 %v2605_v61, %v1155_v46 }
 0x1ad   :  { %v1187_v49 = vsel %vm1054_vm2, %v1172_v47, 0.0 }
 0x1ae   :  { %v1121_v50 = vpop.f32.mrf.mxu3  ;;  %1188 = vadd.xlane.f32.xlu0 %v1187_v49 }
 0x1af   :  { %v1122_v51 = vadd.f32 %v2599_v35, %v1121_v50 }
 0x1b1   :  { %v1156_v18 = vmax.f32 %v1122_v51, 0.0 }
 0x1b3   :  { %v1173_v55 = vmul.f32 %v2605_v61, %v1156_v18 }
 0x1b5   :  { %v1190_v56 = vsel %vm1054_vm2, %v1173_v55, 0.0 }
 0x1b6   :  { %v1124_v57 = vpop.f32.mrf.mxu3  ;;  %1191 = vadd.xlane.f32.xlu1 %v1190_v56 }
 0x1b7   :  { %v1125_v58 = vadd.f32 %v2599_v35, %v1124_v57 }
 0x1b9   :  { %v1157_v59 = vmax.f32 %v1125_v58, 0.0 }
 0x1bb   :  { %v1174_v60 = vmul.f32 %v2605_v61, %v1157_v59 }
 0x1bd   :  { %v1193_v37 = vsel %vm1054_vm2, %v1174_v60, 0.0 }
 0x1be   :  { %v1127_v62 = vpop.f32.mrf.mxu3  ;;  %1194 = vadd.xlane.f32.xlu1 %v1193_v37 }
 0x1bf   :  { %v1128_v63 = vadd.f32 %v2599_v35, %v1127_v62 }
 0x1c1   :  { %v1158_v0 = vmax.f32 %v1128_v63, 0.0 }
 0x1c3   :  { %v1175_v1 = vmul.f32 %v2605_v61, %v1158_v0 }
 0x1c5   :  { %v1196_v2 = vsel %vm1054_vm2, %v1175_v1, 0.0 }
 0x1c6   :  { %v1130_v4 = vpop.f32.mrf.mxu3  ;;  %1197 = vadd.xlane.f32.xlu2 %v1196_v2 }
 0x1c7   :  { %v1131_v48 = vadd.f32 %v2599_v35, %v1130_v4 }
 0x1c9   :  { %v1159_v5 = vmax.f32 %v1131_v48, 0.0 }
 0x1cb   :  { %v1176_v17 = vmul.f32 %v2605_v61, %v1159_v5 }
 0x1cd   :  { %v1199_v6 = vsel %vm1054_vm2, %v1176_v17, 0.0 }
 0x1ce   :  { %v1133_v7 = vpop.f32.mrf.mxu3  ;;  %1200 = vadd.xlane.f32.xlu2 %v1199_v6 }
 0x1cf   :  { %v1134_v8 = vadd.f32 %v2599_v35, %v1133_v7 }
 0x1d1   :  { %v1160_v10 = vmax.f32 %v1134_v8, 0.0 }
 0x1d3   :  { %v1177_v3 = vmul.f32 %v2605_v61, %v1160_v10 }
 0x1d5   :  { %v1202_v11 = vsel %vm1054_vm2, %v1177_v3, 0.0 }
 0x1d6   :  { %v1136_v12 = vpop.f32.mrf.mxu3  ;;  %1203 = vadd.xlane.f32.xlu0 %v1202_v11 }
 0x1d7   :  { %v1137_v13 = vadd.f32 %v2599_v35, %v1136_v12 }
 0x1d9   :  { %v1161_v15 = vmax.f32 %v1137_v13, 0.0 }
 0x1db   :  { %v1178_v28 = vmul.f32 %v2605_v61, %v1161_v15 }
 0x1dd   :  { %v1205_v29 = vsel %vm1054_vm2, %v1178_v28, 0.0 }
 0x1de   :  { %v1139_v14 = vpop.f32.mrf.mxu3  ;;  %1206 = vadd.xlane.f32.xlu1 %v1205_v29 }
 0x1df   :  { %v1140_v16 = vadd.f32 %v2599_v35, %v1139_v14 }
 0x1e1   :  { %v1162_v19 = vmax.f32 %v1140_v16, 0.0 }
 0x1e3   :  { %v1179_v20 = vmul.f32 %v2605_v61, %v1162_v19 }
 0x1e5   :  { %v1208_v21 = vsel %vm1054_vm2, %v1179_v20, 0.0 }
 0x1e6   :  { %v1142_v41 = vpop.f32.mrf.mxu3  ;;  %1209 = vadd.xlane.f32.xlu2 %v1208_v21 }
 0x1e7   :  { %v1143_v32 = vadd.f32 %v2599_v35, %v1142_v41 }
 0x1e9   :  { %v1163_v22 = vmax.f32 %v1143_v32, 0.0 }
 0x1eb   :  { %v1180_v23 = vmul.f32 %v2605_v61, %v1163_v22 }
 0x1ed   :  { %v1211_v24 = vsel %vm1054_vm2, %v1180_v23, 0.0 }
 0x1ee   :  { %v1145_v25 = vpop.f32.mrf.mxu3  ;;  %1212 = vadd.xlane.f32.xlu0 %v1211_v24 }
 0x1ef   :  { %v1146_v26 = vadd.f32 %v2599_v35, %v1145_v25 }
 0x1f1   :  { %v1164_v27 = vmax.f32 %v1146_v26, 0.0 }
 0x1f3   :  { %v1181_v42 = vmul.f32 %v2605_v61, %v1164_v27 }
 0x1f5   :  { %v1214_v30 = vsel %vm1054_vm2, %v1181_v42, 0.0 }
 0x1f6   :  { %v1148_v52 = vpop.f32.mrf.mxu3  ;;  %1215 = vadd.xlane.f32.xlu1 %v1214_v30 }
 0x1f7   :  { %v1149_v53 = vadd.f32 %v2599_v35, %v1148_v52 }
 0x1f9   :  { %v1165_v31 = vmax.f32 %v1149_v53, 0.0 }
 0x1fb   :  { %v1182_v33 = vmul.f32 %v2605_v61, %v1165_v31 }
 0x1fd   :  { %v1217_v34 = vsel %vm1054_vm2, %v1182_v33, 0.0 }
 0x1fe   :  { %v1151_v54 = vpop.f32.mrf.mxu3  ;;  %1218 = vadd.xlane.f32.xlu2 %v1217_v34 }
 0x1ff   :  { %v1152_v36 = vadd.f32 %v2599_v35, %v1151_v54 }
 0x201   :  { %v1166_v38 = vmax.f32 %v1152_v36, 0.0 }
 0x203   :  { %v1183_v39 = vmul.f32 %v2605_v61, %v1166_v38 }
 0x205   :  { %v1220_v40 = vsel %vm1054_vm2, %v1183_v39, 0.0 }
 0x206   :  { %1221 = vadd.xlane.f32.xlu0 %v1220_v40 }
 0x219   :  { %v1186_v9 = vpop.xlane.xlu0 %1185 }
 0x21a   :  { %v1227_v45 = vadd.f32 %v2648_v43, %v1186_v9 }
 0x21c   :  { %v1890_v46 = vmul.f32 -1.442695, %v1227_v45 }
 0x21e   :  { %1998 = vpow2.f32 %v1890_v46 }
 0x221   :  { %v1189_v47 = vpop.xlane.xlu0 %1188 }
 0x222   :  { %v1228_v49 = vadd.f32 %v2648_v43, %v1189_v47 }
 0x224   :  { %v1999_v50 = vpop.eup %1998  ;;  %v1891_v51 = vmul.f32 -1.442695, %v1228_v49 }
 0x225   :  { %v1279_v18 = vadd.f32 1.0, %v1999_v50 }
 0x226   :  { %2000 = vpow2.f32 %v1891_v51 }
 0x227   :  { %2002 = vrcp.f32 %v1279_v18  ;;  %v1303_v37 = vand.u32 2147483648, %v1279_v18  ;;  %v1301_v0 = vand.u32 2147483647, %v1279_v18  ;;  %vm1297_vm4 = vweird.f32 %v1279_v18 }
 0x229   :  { %v1192_v35 = vpop.xlane.xlu1 %1191  ;;  %v1304_v17 = vor.u32 1.1754944e-38, %v1303_v37  ;;  %vm1302_vm7 = vcmp.eq.f32.partialorder %v1301_v0, 8.507059e+37 }
 0x22a   :  { %v1229_v61 = vadd.f32 %v2648_v43, %v1192_v35 }
 0x22c   :  { %v2001_v55 = vpop.eup %2000  ;;  %v1892_v56 = vmul.f32 -1.442695, %v1229_v61 }
 0x22d   :  { %v2003_v57 = vpop.eup %2002  ;;  %v1280_v58 = vadd.f32 1.0, %v2001_v55 }
 0x22e   :  { %v1293_v59 = vmul.f32 %v2003_v57, %v1279_v18  ;;  %2004 = vpow2.f32 %v1892_v56  ;;  %vm1298_vm3 = vweird.f32 %v2003_v57 }
 0x22f   :  { %2006 = vrcp.f32 %v1280_v58  ;;  %vm1299_vm6 = vmor %vm1297_vm4, %vm1298_vm3  ;;  %v1318_v11 = vand.u32 2147483648, %v1280_v58  ;;  %v1316_v15 = vand.u32 2147483647, %v1280_v58  ;;  %vm1312_vm9 = vweird.f32 %v1280_v58 }
 0x230   :  { %v1294_v60 = vsub.f32 1.0, %v1293_v59 }
 0x231   :  { %v1195_v62 = vpop.xlane.xlu1 %1194  ;;  %v1319_v20 = vor.u32 1.1754944e-38, %v1318_v11  ;;  %vm1317_vm11 = vcmp.eq.f32.partialorder %v1316_v15, 8.507059e+37 }
 0x232   :  { %v1295_v63 = vmul.f32 %v2003_v57, %v1294_v60  ;;  %v1230_v1 = vadd.f32 %v2648_v43, %v1195_v62 }
 0x234   :  { %v2005_v2 = vpop.eup %2004  ;;  %v1296_v4 = vadd.f32 %v2003_v57, %v1295_v63  ;;  %v1893_v48 = vmul.f32 -1.442695, %v1230_v1 }
 0x235   :  { %v2007_v5 = vpop.eup %2006  ;;  %v1281_v6 = vadd.f32 1.0, %v2005_v2 }
 0x236   :  { %v1300_v7 = vsel %vm1299_vm6, %v2003_v57, %v1296_v4  ;;  %v1308_v8 = vmul.f32 %v2007_v5, %v1280_v58  ;;  %2008 = vpow2.f32 %v1893_v48  ;;  %vm1313_vm8 = vweird.f32 %v2007_v5 }
 0x237   :  { %v1305_v10 = vsel %vm1302_vm7, %v1304_v17, %v1300_v7  ;;  %2010 = vrcp.f32 %v1281_v6  ;;  %vm1314_vm10 = vmor %vm1312_vm9, %vm1313_vm8  ;;  %v1333_v23 = vand.u32 2147483648, %v1281_v6  ;;  %v1331_v26 = vand.u32 2147483647, %v1281_v6 }
 0x238   :  { %1488 = vst.msk [vmem:[%s2722_s7] sm:$0xff] %vm1487_vm5, %v1305_v10  ;;  %v1309_v3 = vsub.f32 1.0, %v1308_v8  ;;  %vm1327_vm13 = vweird.f32 %v1281_v6 }
 0x239   :  { %v1198_v12 = vpop.xlane.xlu2 %1197  ;;  %v1334_v31 = vor.u32 1.1754944e-38, %v1333_v23  ;;  %vm1332_vm15 = vcmp.eq.f32.partialorder %v1331_v26, 8.507059e+37 }
 0x23a   :  { %v1310_v13 = vmul.f32 %v2007_v5, %v1309_v3  ;;  %v1231_v28 = vadd.f32 %v2648_v43, %v1198_v12 }
 0x23c   :  { %v2009_v29 = vpop.eup %2008  ;;  %v1311_v14 = vadd.f32 %v2007_v5, %v1310_v13  ;;  %v1894_v16 = vmul.f32 -1.442695, %v1231_v28 }
 0x23d   :  { %v2011_v19 = vpop.eup %2010  ;;  %v1282_v21 = vadd.f32 1.0, %v2009_v29 }
 0x23e   :  { %v1315_v41 = vsel %vm1314_vm10, %v2007_v5, %v1311_v14  ;;  %v1323_v44 = vmul.f32 %v2011_v19, %v1281_v6  ;;  %2012 = vpow2.f32 %v1894_v16  ;;  %vm1328_vm12 = vweird.f32 %v2011_v19 }
 0x23f   :  { %v1320_v32 = vsel %vm1317_vm11, %v1319_v20, %v1315_v41  ;;  %2014 = vrcp.f32 %v1282_v21  ;;  %vm1329_vm14 = vmor %vm1327_vm13, %vm1328_vm12  ;;  %v1348_v39 = vand.u32 2147483648, %v1282_v21  ;;  %v1346_v45 = vand.u32 2147483647, %v1282_v21 }
 0x240   :  { %1489 = vst.msk [vmem:[%s2722_s7 + $0x8] sm:$0xff] %vm1487_vm5, %v1320_v32  ;;  %v1324_v22 = vsub.f32 1.0, %v1323_v44  ;;  %vm1342_vm1 = vweird.f32 %v1282_v21 }
 0x241   :  { %v1201_v24 = vpop.xlane.xlu2 %1200  ;;  %v1349_v18 = vor.u32 1.1754944e-38, %v1348_v39  ;;  %vm1347_vm3 = vcmp.eq.f32.partialorder %v1346_v45, 8.507059e+37 }
 0x242   :  { %v1325_v25 = vmul.f32 %v2011_v19, %v1324_v22  ;;  %v1232_v27 = vadd.f32 %v2648_v43, %v1201_v24 }
 0x244   :  { %v2013_v42 = vpop.eup %2012  ;;  %v1326_v30 = vadd.f32 %v2011_v19, %v1325_v25  ;;  %v1895_v52 = vmul.f32 -1.442695, %v1232_v27 }
 0x245   :  { %v2015_v53 = vpop.eup %2014  ;;  %v1283_v33 = vadd.f32 1.0, %v2013_v42 }
 0x246   :  { %v1330_v34 = vsel %vm1329_vm14, %v2011_v19, %v1326_v30  ;;  %v1338_v54 = vmul.f32 %v2015_v53, %v1282_v21  ;;  %2016 = vpow2.f32 %v1895_v52  ;;  %vm1343_vm0 = vweird.f32 %v2015_v53 }
 0x247   :  { %v1335_v36 = vsel %vm1332_vm15, %v1334_v31, %v1330_v34  ;;  %2018 = vrcp.f32 %v1283_v33  ;;  %vm1344_vm2 = vmor %vm1342_vm1, %vm1343_vm0  ;;  %v1363_v58 = vand.u32 2147483648, %v1283_v33  ;;  %v1361_v37 = vand.u32 2147483647, %v1283_v33 }
 0x248   :  { %1490 = vst.msk [vmem:[%s2722_s7 + $0x10] sm:$0xff] %vm1487_vm5, %v1335_v36  ;;  %v1339_v38 = vsub.f32 1.0, %v1338_v54  ;;  %vm1357_vm6 = vweird.f32 %v1283_v33 }
 0x249   :  { %v1204_v40 = vpop.xlane.xlu0 %1203  ;;  %v1364_v4 = vor.u32 1.1754944e-38, %v1363_v58  ;;  %vm1362_vm8 = vcmp.eq.f32.partialorder %v1361_v37, 8.507059e+37 }
 0x24a   :  { %v1340_v9 = vmul.f32 %v2015_v53, %v1339_v38  ;;  %v1233_v46 = vadd.f32 %v2648_v43, %v1204_v40 }
 0x24c   :  { %v2017_v47 = vpop.eup %2016  ;;  %v1341_v49 = vadd.f32 %v2015_v53, %v1340_v9  ;;  %v1896_v50 = vmul.f32 -1.442695, %v1233_v46 }
 0x24d   :  { %v2019_v51 = vpop.eup %2018  ;;  %v1284_v35 = vadd.f32 1.0, %v2017_v47 }
 0x24e   :  { %v1345_v61 = vsel %vm1344_vm2, %v2015_v53, %v1341_v49  ;;  %v1353_v55 = vmul.f32 %v2019_v51, %v1283_v33  ;;  %2020 = vpow2.f32 %v1896_v50  ;;  %vm1358_vm4 = vweird.f32 %v2019_v51 }
 0x24f   :  { %v1350_v56 = vsel %vm1347_vm3, %v1349_v18, %v1345_v61  ;;  %2022 = vrcp.f32 %v1284_v35  ;;  %vm1359_vm7 = vmor %vm1357_vm6, %vm1358_vm4  ;;  %v1378_v8 = vand.u32 2147483648, %v1284_v35  ;;  %v1376_v11 = vand.u32 2147483647, %v1284_v35 }
 0x250   :  { %1491 = vst.msk [vmem:[%s2722_s7 + $0x18] sm:$0xff] %vm1487_vm5, %v1350_v56  ;;  %v1354_v57 = vsub.f32 1.0, %v1353_v55  ;;  %vm1372_vm10 = vweird.f32 %v1284_v35 }
 0x251   :  { %v1207_v59 = vpop.xlane.xlu1 %1206  ;;  %v1379_v14 = vor.u32 1.1754944e-38, %v1378_v8  ;;  %vm1377_vm12 = vcmp.eq.f32.partialorder %v1376_v11, 8.507059e+37 }
 0x252   :  { %v1355_v60 = vmul.f32 %v2019_v51, %v1354_v57  ;;  %v1234_v62 = vadd.f32 %v2648_v43, %v1207_v59 }
 0x254   :  { %v2021_v63 = vpop.eup %2020  ;;  %v1356_v0 = vadd.f32 %v2019_v51, %v1355_v60  ;;  %v1897_v1 = vmul.f32 -1.442695, %v1234_v62 }
 0x255   :  { %v2023_v2 = vpop.eup %2022  ;;  %v1285_v48 = vadd.f32 1.0, %v2021_v63 }
 0x256   :  { %v1360_v5 = vsel %vm1359_vm7, %v2019_v51, %v1356_v0  ;;  %v1368_v17 = vmul.f32 %v2023_v2, %v1284_v35  ;;  %2024 = vpow2.f32 %v1897_v1  ;;  %vm1373_vm9 = vweird.f32 %v2023_v2 }
 0x257   :  { %v1365_v6 = vsel %vm1362_vm8, %v1364_v4, %v1360_v5  ;;  %2026 = vrcp.f32 %v1285_v48  ;;  %vm1374_vm11 = vmor %vm1372_vm10, %vm1373_vm9  ;;  %v1393_v44 = vand.u32 2147483648, %v1285_v48  ;;  %v1391_v23 = vand.u32 2147483647, %v1285_v48 }
 0x258   :  { %1492 = vst.msk [vmem:[%s2722_s7 + $0x20] sm:$0xff] %vm1487_vm5, %v1365_v6  ;;  %v1369_v7 = vsub.f32 1.0, %v1368_v17  ;;  %vm1387_vm14 = vweird.f32 %v1285_v48 }
 0x259   :  { %v1210_v10 = vpop.xlane.xlu2 %1209  ;;  %v1394_v30 = vor.u32 1.1754944e-38, %v1393_v44  ;;  %vm1392_vm0 = vcmp.eq.f32.partialorder %v1391_v23, 8.507059e+37 }
 0x25a   :  { %v1370_v3 = vmul.f32 %v2023_v2, %v1369_v7  ;;  %v1235_v12 = vadd.f32 %v2648_v43, %v1210_v10 }
 0x25c   :  { %v2025_v13 = vpop.eup %2024  ;;  %v1371_v15 = vadd.f32 %v2023_v2, %v1370_v3  ;;  %v1898_v28 = vmul.f32 -1.442695, %v1235_v12 }
 0x25d   :  { %v2027_v29 = vpop.eup %2026  ;;  %v1286_v16 = vadd.f32 1.0, %v2025_v13 }
 0x25e   :  { %v1375_v19 = vsel %vm1374_vm11, %v2023_v2, %v1371_v15  ;;  %v1383_v20 = vmul.f32 %v2027_v29, %v1285_v48  ;;  %2028 = vpow2.f32 %v1898_v28  ;;  %vm1388_vm13 = vweird.f32 %v2027_v29 }
 0x25f   :  { %v1380_v21 = vsel %vm1377_vm12, %v1379_v14, %v1375_v19  ;;  %2030 = vrcp.f32 %v1286_v16  ;;  %vm1389_vm15 = vmor %vm1387_vm14, %vm1388_vm13  ;;  %v1408_v54 = vand.u32 2147483648, %v1286_v16  ;;  %v1406_v39 = vand.u32 2147483647, %v1286_v16 }
 0x260   :  { %1493 = vst.msk [vmem:[%s2722_s7 + $0x28] sm:$0xff] %vm1487_vm5, %v1380_v21  ;;  %v1384_v41 = vsub.f32 1.0, %v1383_v20  ;;  %vm1402_vm2 = vweird.f32 %v1286_v16 }
 0x261   :  { %v1213_v32 = vpop.xlane.xlu0 %1212  ;;  %v1409_v49 = vor.u32 1.1754944e-38, %v1408_v54  ;;  %vm1407_vm4 = vcmp.eq.f32.partialorder %v1406_v39, 8.507059e+37 }
 0x262   :  { %v1385_v22 = vmul.f32 %v2027_v29, %v1384_v41  ;;  %v1236_v24 = vadd.f32 %v2648_v43, %v1213_v32 }
 0x264   :  { %v2029_v25 = vpop.eup %2028  ;;  %v1386_v26 = vadd.f32 %v2027_v29, %v1385_v22  ;;  %v1899_v27 = vmul.f32 -1.442695, %v1236_v24 }
 0x265   :  { %v2031_v42 = vpop.eup %2030  ;;  %v1287_v52 = vadd.f32 1.0, %v2029_v25 }
 0x266   :  { %v1390_v53 = vsel %vm1389_vm15, %v2027_v29, %v1386_v26  ;;  %v1398_v31 = vmul.f32 %v2031_v42, %v1286_v16  ;;  %2032 = vpow2.f32 %v1899_v27  ;;  %vm1403_vm1 = vweird.f32 %v2031_v42 }
 0x267   :  { %v1395_v33 = vsel %vm1392_vm0, %v1394_v30, %v1390_v53  ;;  %2034 = vrcp.f32 %v1287_v52  ;;  %vm1404_vm3 = vmor %vm1402_vm2, %vm1403_vm1  ;;  %v1423_v55 = vand.u32 2147483648, %v1287_v52  ;;  %v1421_v58 = vand.u32 2147483647, %v1287_v52 }
 0x268   :  { %1494 = vst.msk [vmem:[%s2722_s7 + $0x30] sm:$0xff] %vm1487_vm5, %v1395_v33  ;;  %v1399_v34 = vsub.f32 1.0, %v1398_v31  ;;  %vm1417_vm7 = vweird.f32 %v1287_v52 }
 0x269   :  { %v1216_v36 = vpop.xlane.xlu1 %1215  ;;  %v1424_v0 = vor.u32 1.1754944e-38, %v1423_v55  ;;  %vm1422_vm9 = vcmp.eq.f32.partialorder %v1421_v58, 8.507059e+37 }
 0x26a   :  { %v1400_v38 = vmul.f32 %v2031_v42, %v1399_v34  ;;  %v1237_v40 = vadd.f32 %v2648_v43, %v1216_v36 }
 0x26c   :  { %v2033_v9 = vpop.eup %2032  ;;  %v1401_v45 = vadd.f32 %v2031_v42, %v1400_v38  ;;  %v1900_v46 = vmul.f32 -1.442695, %v1237_v40 }
 0x26d   :  { %v2035_v47 = vpop.eup %2034  ;;  %v1288_v50 = vadd.f32 1.0, %v2033_v9 }
 0x26e   :  { %v1405_v51 = vsel %vm1404_vm3, %v2031_v42, %v1401_v45  ;;  %v1413_v18 = vmul.f32 %v2035_v47, %v1287_v52  ;;  %2036 = vpow2.f32 %v1900_v46  ;;  %vm1418_vm6 = vweird.f32 %v2035_v47 }
 0x26f   :  { %v1410_v35 = vsel %vm1407_vm4, %v1409_v49, %v1405_v51  ;;  %2038 = vrcp.f32 %v1288_v50  ;;  %vm1419_vm8 = vmor %vm1417_vm7, %vm1418_vm6  ;;  %v1438_v17 = vand.u32 2147483648, %v1288_v50  ;;  %v1436_v8 = vand.u32 2147483647, %v1288_v50 }
 0x270   :  { %1495 = vst.msk [vmem:[%s2722_s7 + $0x38] sm:$0xff] %vm1487_vm5, %v1410_v35  ;;  %v1414_v61 = vsub.f32 1.0, %v1413_v18  ;;  %vm1432_vm11 = vweird.f32 %v1288_v50 }
 0x271   :  { %v1219_v56 = vpop.xlane.xlu2 %1218  ;;  %v1439_v15 = vor.u32 1.1754944e-38, %v1438_v17  ;;  %vm1437_vm13 = vcmp.eq.f32.partialorder %v1436_v8, 8.507059e+37 }
 0x272   :  { %v1415_v57 = vmul.f32 %v2035_v47, %v1414_v61  ;;  %v1238_v59 = vadd.f32 %v2648_v43, %v1219_v56 }
 0x274   :  { %v2037_v60 = vpop.eup %2036  ;;  %v1416_v37 = vadd.f32 %v2035_v47, %v1415_v57  ;;  %v1901_v62 = vmul.f32 -1.442695, %v1238_v59 }
 0x275   :  { %v2039_v63 = vpop.eup %2038  ;;  %v1289_v1 = vadd.f32 1.0, %v2037_v60 }
 0x276   :  { %v1420_v2 = vsel %vm1419_vm8, %v2035_v47, %v1416_v37  ;;  %v1428_v4 = vmul.f32 %v2039_v63, %v1288_v50  ;;  %2040 = vpow2.f32 %v1901_v62  ;;  %vm1433_vm10 = vweird.f32 %v2039_v63 }
 0x277   :  { %v1425_v48 = vsel %vm1422_vm9, %v1424_v0, %v1420_v2  ;;  %2042 = vrcp.f32 %v1289_v1  ;;  %vm1434_vm12 = vmor %vm1432_vm11, %vm1433_vm10  ;;  %v1453_v19 = vand.u32 2147483648, %v1289_v1  ;;  %v1451_v21 = vand.u32 2147483647, %v1289_v1 }
 0x278   :  { %1496 = vst.msk [vmem:[%s2722_s7 + $0x40] sm:$0xff] %vm1487_vm5, %v1425_v48  ;;  %v1429_v5 = vsub.f32 1.0, %v1428_v4  ;;  %vm1447_vm15 = vweird.f32 %v1289_v1 }
 0x279   :  { %v1222_v6 = vpop.xlane.xlu0 %1221  ;;  %v1454_v22 = vor.u32 1.1754944e-38, %v1453_v19  ;;  %vm1452_vm1 = vcmp.eq.f32.partialorder %v1451_v21, 8.507059e+37 }
 0x27a   :  { %v1430_v7 = vmul.f32 %v2039_v63, %v1429_v5  ;;  %v1239_v10 = vadd.f32 %v2648_v43, %v1222_v6 }
 0x27c   :  { %v2041_v3 = vpop.eup %2040  ;;  %v1431_v11 = vadd.f32 %v2039_v63, %v1430_v7  ;;  %v1902_v12 = vmul.f32 -1.442695, %v1239_v10 }
 0x27d   :  { %v2043_v13 = vpop.eup %2042  ;;  %v1290_v28 = vadd.f32 1.0, %v2041_v3 }
 0x27e   :  { %v1435_v29 = vsel %vm1434_vm12, %v2039_v63, %v1431_v11  ;;  %v1443_v14 = vmul.f32 %v2043_v13, %v1289_v1  ;;  %2044 = vpow2.f32 %v1902_v12  ;;  %vm1448_vm14 = vweird.f32 %v2043_v13 }
 0x27f   :  { %v1440_v16 = vsel %vm1437_vm13, %v1439_v15, %v1435_v29  ;;  %2046 = vrcp.f32 %v1290_v28  ;;  %vm1449_vm0 = vmor %vm1447_vm15, %vm1448_vm14  ;;  %v1468_v42 = vand.u32 2147483648, %v1290_v28  ;;  %v1466_v52 = vand.u32 2147483647, %v1290_v28 }
 0x280   :  { %1497 = vst.msk [vmem:[%s2722_s7 + $0x48] sm:$0xff] %vm1487_vm5, %v1440_v16  ;;  %v1444_v43 = vsub.f32 1.0, %v1443_v14  ;;  %vm1462_vm3 = vweird.f32 %v1290_v28 }
 0x281   :  { %v1469_v33 = vor.u32 1.1754944e-38, %v1468_v42  ;;  %vm1467_vm6 = vcmp.eq.f32.partialorder %v1466_v52, 8.507059e+37 }
 0x282   :  { %v1445_v20 = vmul.f32 %v2043_v13, %v1444_v43 }
 0x284   :  { %v2045_v41 = vpop.eup %2044  ;;  %v1446_v44 = vadd.f32 %v2043_v13, %v1445_v20 }
 0x285   :  { %v2047_v32 = vpop.eup %2046  ;;  %v1291_v23 = vadd.f32 1.0, %v2045_v41 }
 0x286   :  { %v1450_v24 = vsel %vm1449_vm0, %v2043_v13, %v1446_v44  ;;  %v1458_v25 = vmul.f32 %v2047_v32, %v1290_v28  ;;  %vm1463_vm2 = vweird.f32 %v2047_v32 }
 0x287   :  { %v1455_v26 = vsel %vm1452_vm1, %v1454_v22, %v1450_v24  ;;  %2048 = vrcp.f32 %v1291_v23  ;;  %vm1464_vm4 = vmor %vm1462_vm3, %vm1463_vm2  ;;  %v1483_v39 = vand.u32 2147483648, %v1291_v23  ;;  %v1481_v9 = vand.u32 2147483647, %v1291_v23 }
 0x288   :  { %1498 = vst.msk [vmem:[%s2722_s7 + $0x50] sm:$0xff] %vm1487_vm5, %v1455_v26  ;;  %v1459_v27 = vsub.f32 1.0, %v1458_v25  ;;  %vm1477_vm8 = vweird.f32 %v1291_v23 }
 0x289   :  { %v1484_v46 = vor.u32 1.1754944e-38, %v1483_v39  ;;  %vm1482_vm10 = vcmp.eq.f32.partialorder %v1481_v9, 8.507059e+37 }
 0x28a   :  { %v1460_v30 = vmul.f32 %v2047_v32, %v1459_v27 }
 0x28c   :  { %v1461_v53 = vadd.f32 %v2047_v32, %v1460_v30 }
 0x28d   :  { %v2049_v31 = vpop.eup %2048 }
 0x28e   :  { %v1465_v34 = vsel %vm1464_vm4, %v2047_v32, %v1461_v53  ;;  %v1473_v54 = vmul.f32 %v2049_v31, %v1291_v23  ;;  %vm1478_vm7 = vweird.f32 %v2049_v31 }
 0x28f   :  { %v1470_v36 = vsel %vm1467_vm6, %v1469_v33, %v1465_v34  ;;  %vm1479_vm9 = vmor %vm1477_vm8, %vm1478_vm7 }
 0x290   :  { %1499 = vst.msk [vmem:[%s2722_s7 + $0x58] sm:$0xff] %vm1487_vm5, %v1470_v36  ;;  %v1474_v38 = vsub.f32 1.0, %v1473_v54 }
 0x292   :  { %v1475_v40 = vmul.f32 %v2049_v31, %v1474_v38 }
 0x294   :  { %v1476_v45 = vadd.f32 %v2049_v31, %v1475_v40 }
 0x296   :  { %v1480_v47 = vsel %vm1479_vm9, %v2049_v31, %v1476_v45 }
 0x297   :  { %v1485_v49 = vsel %vm1482_vm10, %v1484_v46, %v1480_v47 }
 0x298   :  { %1500 = vst.msk [vmem:[%s2722_s7 + $0x60] sm:$0xff] %vm1487_vm5, %v1485_v49 }

</bundles_post_ra>
